<compile_context>
chip_gen: v6e
topology: v6e:2x2x1
jax: 0.10.0
libtpu: 0.0.40
codegen_flags: <defaults>
</compile_context>

<pallas_src>
import numpy as np
import jax
import jax.numpy as jnp
from jax.experimental import pallas as pl
from jax.experimental.pallas import tpu as pltpu

SIGMA = 0.1          # matches DataAugmentation(sigma=0.1)
FILT_LEN = 4         # db2 filter length
LANE = 128


def _round_up(x, m):
    return ((x + m - 1) // m) * m


# ------------------------- db2 filter bank (exact) -------------------------
def _db2_filters():
    s3 = np.sqrt(3.0)
    d = 4.0 * np.sqrt(2.0)
    rec_lo = np.array([(1 + s3), (3 + s3), (3 - s3), (1 - s3)], dtype=np.float64) / d
    dec_lo = rec_lo[::-1].copy()
    rec_hi = np.array([((-1.0) ** n) * dec_lo[n] for n in range(4)], dtype=np.float64)
    dec_hi = rec_hi[::-1].copy()
    return dec_lo, dec_hi, rec_lo, rec_hi


def _sym_ext_index(p, n):
    # pywt mode='symmetric' (half-sample symmetric): ... x2 x1 x0 | x0 .. xN-1 | xN-1 xN-2 ...
    if p < 0:
        return -p - 1
    if p >= n:
        return 2 * n - 1 - p
    return p


def _build_wavelet_matrices_np(n):
    """Analysis (N,NC) and synthesis (NC,N) matrices reproducing pywt.dwt/idwt (db2, symmetric)."""
    dec_lo, dec_hi, rec_lo, rec_hi = _db2_filters()
    nc = (n + FILT_LEN - 1) // 2                     # pywt dwt output length

    w_lo = np.zeros((n, nc), dtype=np.float64)
    w_hi = np.zeros((n, nc), dtype=np.float64)
    for k in range(nc):
        for j in range(FILT_LEN):
            p = 2 * k + 1 - j                        # pywt: cA[k] = sum_j dec_lo[j] * x_sym[2k+1-j]
            src = _sym_ext_index(p, n)
            w_lo[src, k] += dec_lo[j]
            w_hi[src, k] += dec_hi[j]

    s_lo = np.zeros((nc, n), dtype=np.float64)
    s_hi = np.zeros((nc, n), dtype=np.float64)
    for out_n in range(n):
        for k in range(nc):
            idx = out_n + (FILT_LEN - 2) - 2 * k     # pywt idwt trims first L-2 samples
            if 0 <= idx < FILT_LEN:
                s_lo[k, out_n] += rec_lo[idx]
                s_hi[k, out_n] += rec_hi[idx]

    return w_lo, w_hi, s_lo, s_hi, nc


def _build_detail_synthesis_matrix(n, sigma):
    """(NCP, N) f32 matrix M with rows [0:NC] = sigma * S_hi and rows [NC:NCP] exactly zero,
    so that  noise_padded @ M == sigma * idwt(0, noise)  for db2/symmetric."""
    w_lo, w_hi, s_lo, s_hi, nc = _build_wavelet_matrices_np(n)
    ncp = _round_up(nc, LANE)
    S = np.zeros((ncp, n), dtype=np.float64)
    S[:nc, :] = sigma * s_hi
    # TODO(synk): for long signals (N >~ 2k) store S in bf16 and/or switch to a 4-tap banded
    # stencil (pltpu.roll + VPU FMAs) to keep VMEM O(N); fine for augmentation accuracy but
    # would require loosening the f32 test tolerances below.
    return jnp.asarray(S, dtype=jnp.float32), nc, ncp, (w_lo, w_hi, s_lo, s_hi)


# ------------------------------- Pallas kernel ------------------------------
def _dwt_aug_kernel(x_ref, noise_ref, s_ref, out_ref):
    # out = x + noise @ (sigma * S_hi)   (sigma already folded into s_ref)
    det = jnp.dot(noise_ref[...], s_ref[...], preferred_element_type=jnp.float32)
    out_ref[...] = (x_ref[...] + det).astype(out_ref.dtype)


def _pick_batch_tile(b_pad, block_b):
    """Largest multiple of 8 that divides b_pad, is <= block_b, and (when b_pad >= 16) is
    <= b_pad // 2 so the grid has >= 2 steps (lets v7x shard the batch axis across its 2 TCs)."""
    cap = min(block_b, b_pad)
    if b_pad >= 16:
        cap = min(cap, b_pad // 2)
    cap = max(cap, 8)
    best = 8
    for t in range(8, cap + 1, 8):
        if b_pad % t == 0:
            best = t
    return best


def data_augmentation(x, noise, S, *, block_b=1024):
    """x: (B, N) f32; noise: (B, NCP) f32 (cD noise in cols [0:NC], zeros beyond);
    S: (NCP, N) f32 = sigma * S_hi (rows beyond NC are zero)."""
    b, n = x.shape
    ncp = S.shape[0]
    assert noise.shape == (b, ncp) and S.shape == (ncp, n)

    # Pad B only to a sublane multiple (8); tb is picked to divide b_pad exactly.
    b_pad = _round_up(b, 8)
    tb = _pick_batch_tile(b_pad, block_b)
    if b_pad != b:
        x = jnp.pad(x, ((0, b_pad - b), (0, 0)))
        noise = jnp.pad(noise, ((0, b_pad - b), (0, 0)))
    grid = (b_pad // tb,)

    # VMEM budget: double-buffered x/noise/out tiles + single-buffered resident S, with
    # headroom; floor well under (and cap at 48 MiB, below) v7x's 64 MiB physical VMEM.
    tile_bytes = 4 * tb * (n + ncp + n)                    # x + noise + out, per buffer
    resident_bytes = 4 * ncp * n                           # S (Buffered(1))
    vmem_limit = int(1.5 * (2 * tile_bytes + resident_bytes)) + (1 << 20)
    vmem_limit = max(8 << 20, min(vmem_limit, 48 << 20))

    cost = pl.CostEstimate(
        flops=2 * b_pad * ncp * n + b_pad * n,             # one MXU matmul + the add
        transcendentals=0,
        bytes_accessed=4 * (b_pad * n + b_pad * ncp + ncp * n + b_pad * n))

    out = pl.pallas_call(
        _dwt_aug_kernel,
        out_shape=jax.ShapeDtypeStruct((b_pad, n), x.dtype),
        grid=grid,
        in_specs=[
            pl.BlockSpec((tb, n), lambda i: (i, 0)),       # x      (tiled over batch)
            pl.BlockSpec((tb, ncp), lambda i: (i, 0)),     # noise  (tiled over batch)
            pl.BlockSpec((ncp, n), lambda i: (0, 0),       # sigma*S_hi, resident across grid
                         pipeline_mode=pl.Buffered(1)),    #   constant index -> 1 buffer
        ],
        out_specs=pl.BlockSpec((tb, n), lambda i: (i, 0)),
        compiler_params=pltpu.CompilerParams(
            dimension_semantics=("parallel",),
            vmem_limit_bytes=vmem_limit,
        ),
        cost_estimate=cost,
    )(x, noise, S)
    return out[:b]


# ----------------------------------- main -----------------------------------
if __name__ == "__main__":
    B, N = 8, 128
    S_sigma, NC, NCP, (w_lo, w_hi, s_lo, s_hi) = _build_detail_synthesis_matrix(N, SIGMA)

    key = jax.random.PRNGKey(0)
    kx, kn = jax.random.split(key)
    x = jax.random.normal(kx, (B, N), dtype=jnp.float32)
    # TODO(synk): torch.randn uses torch's RNG stream; jax.random.normal is a distributional
    # match. (Could also generate the noise in-kernel via pltpu.prng_seed/stateful_normal to
    # drop the noise HBM stream entirely, at the cost of host-side reproducibility checks.)
    noise_cd = jax.random.normal(kn, (B, NC), dtype=jnp.float32)      # shape of cD, per the module
    noise = jnp.zeros((B, NCP), dtype=jnp.float32).at[:, :NC].set(noise_cd)

    out = jax.block_until_ready(data_augmentation(x, noise, S_sigma))

    # (1) Perfect-reconstruction premise behind the collapse: W @ S == I (float64).
    recon_err = np.abs(w_lo @ s_lo + w_hi @ s_hi - np.eye(N)).max()
    assert recon_err < 1e-12, f"perfect-reconstruction check failed: {recon_err}"

    # (2) Same-precision on-device reference of the collapsed math.
    ref_dev = x + jnp.dot(noise, S_sigma, preferred_element_type=jnp.float32)
    np.testing.assert_allclose(np.asarray(out), np.asarray(ref_dev), rtol=1e-4, atol=1e-4)

    # (3) Full float64 DWT -> perturb detail coeffs -> IDWT path of the original module.
    x64 = np.asarray(x, np.float64)
    n64 = np.asarray(noise_cd, np.float64)
    cA = x64 @ w_lo
    cD = x64 @ w_hi + SIGMA * n64
    ref64 = cA @ s_lo + cD @ s_hi
    np.testing.assert_allclose(np.asarray(out), ref64, rtol=5e-3, atol=5e-3)

    print("KERNEL_OK")
</pallas_src>

<mosaic_0001>
module attributes {stable_mosaic.version = 11 : i64} {
  func.func @_dwt_aug_kernel(%arg0: i32, %arg1: memref<8x128xf32, #tpu.memory_space<vmem>>, %arg2: memref<8x128xf32, #tpu.memory_space<vmem>>, %arg3: memref<128x128xf32, #tpu.memory_space<vmem>>, %arg4: memref<8x128xf32, #tpu.memory_space<vmem>>) attributes {dimension_semantics = [#tpu.dimension_semantics<parallel>], iteration_bounds = array<i64: 1>, scalar_prefetch = 0 : i64, scratch_operands = 0 : i64, tpu.core_type = #tpu.core_type<tc>, window_params = [{transform_indices = @transform_0, window_bounds = array<i64: 8, 128>}, {transform_indices = @transform_1, window_bounds = array<i64: 8, 128>}, {pipeline_mode = #tpu.pipeline_mode<synchronous>, transform_indices = @transform_2, window_bounds = array<i64: 128, 128>}, {transform_indices = @transform_3, window_bounds = array<i64: 8, 128>}]} {
    %c0 = arith.constant 0 : index
    %c0_0 = arith.constant 0 : index
    %0 = vector.load %arg2[%c0, %c0_0] : memref<8x128xf32, #tpu.memory_space<vmem>>, vector<8x128xf32>
    %c0_1 = arith.constant 0 : index
    %c0_2 = arith.constant 0 : index
    %1 = vector.load %arg3[%c0_1, %c0_2] : memref<128x128xf32, #tpu.memory_space<vmem>>, vector<128x128xf32>
    %cst = arith.constant dense<0.000000e+00> : vector<8x128xf32>
    %2 = tpu.matmul %0, %1, %cst {dimension_numbers = #tpu.dot_dimension_numbers<[1], [0], [0], [1], [0, 0, 1, 1], [], []>} : vector<8x128xf32>, vector<128x128xf32>, vector<8x128xf32> -> vector<8x128xf32>
    %c0_3 = arith.constant 0 : index
    %c0_4 = arith.constant 0 : index
    %3 = vector.load %arg1[%c0_3, %c0_4] : memref<8x128xf32, #tpu.memory_space<vmem>>, vector<8x128xf32>
    %4 = arith.addf %3, %2 : vector<8x128xf32>
    %c0_5 = arith.constant 0 : index
    %c0_6 = arith.constant 0 : index
    %5 = vector.load %arg4[%c0_5, %c0_6] : memref<8x128xf32, #tpu.memory_space<vmem>>, vector<8x128xf32>
    tpu.vector_store %arg4[%c0_5, %c0_6], %4 {strides = array<i32>} : memref<8x128xf32, #tpu.memory_space<vmem>>, vector<8x128xf32>,
    return
  }
  func.func @transform_0(%arg0: i32) -> (i32, i32) {
    %c0_i32 = arith.constant 0 : i32
    %c0_i32_0 = arith.constant 0 : i32
    return %arg0, %c0_i32 : i32, i32
  }
  func.func @transform_1(%arg0: i32) -> (i32, i32) {
    %c0_i32 = arith.constant 0 : i32
    %c0_i32_0 = arith.constant 0 : i32
    return %arg0, %c0_i32 : i32, i32
  }
  func.func @transform_2(%arg0: i32) -> (i32, i32) {
    %c0_i32 = arith.constant 0 : i32
    %c0_i32_0 = arith.constant 0 : i32
    %c0_i32_1 = arith.constant 0 : i32
    return %c0_i32, %c0_i32_0 : i32, i32
  }
  func.func @transform_3(%arg0: i32) -> (i32, i32) {
    %c0_i32 = arith.constant 0 : i32
    %c0_i32_0 = arith.constant 0 : i32
    return %arg0, %c0_i32 : i32, i32
  }
}

</mosaic_0001>

<bundles_post_ra>
// kernel: tpu_custom_call.1
= control target key start
LH: loop header
LB: loop body
LE: loop exit
PB: predicated region body
PF: predicated region fallthrough
CT: control target
= control target key end

     0   :  { %8 = vsyncpa [#allocation3], 0  ;;  %s344_s0 = inlined_call_operand.hbm [shape: f32[8,128], index: 0, kind: input, shape index: {}]   ;;  %s345_s1 = inlined_call_operand.hbm [shape: f32[8,128], index: 1, kind: input, shape index: {}]   ;;  %s346_s2 = inlined_call_operand.hbm [shape: f32[128,128], index: 2, kind: input, shape index: {}]   ;;  %s347_s3 = inlined_call_operand.hbm [shape: f32[8,128], index: 3, kind: output, shape index: {}]  }
   0x1   :  { %9 = vsyncpa [#allocation6], 0 }
   0x2   :  { %10 = vsyncpa [#allocation4], 0  ;;  %s304_s12 = smov [#allocation5]   ;;  %s305_s14 = smov [#allocation2]  }
   0x3   :  { %s27_s13 = sshll.u32 %s304_s12, 4  ;;  %s17_s15 = sshll.u32 %s305_s14, 4  ;;  %s28_s13 = int_to_ptr.vmem [resolvable:$true] %s27_s13  ;;  %s18_s15 = int_to_ptr.vmem [resolvable:$true] %s17_s15 }
   0x4   :  { %s226_s16 = scalar_lea.vmem %s28_s13, 128  ;;  %p231_p1 = scmp.lt.s32.totalorder %s28_s13, %s28_s13 }
   0x5   :  { %p227_p0 = scmp.ne.s32.totalorder %s28_s13, %s226_s16  ;;  %p232_p2 = scmp.lt.s32.totalorder %s226_s16, %s226_s16 }
   0x7   :  { %p233_p3 = por %p232_p2, %p231_p1 }
   0x9   :  { %p234_p4 = pnand %p233_p3, %p227_p0 }
   0xb   :  { %237 = shalt.err (!%p234_p4)
}
   0xc   :  { %30 = dma.hbm_to_vmem [thread:$0]  %s345_s1, 128, %s28_s13, [#allocation6]  }
   0xd   :  { %s246_s19 = scalar_lea.vmem %s18_s15, 128  ;;  %p251_p6 = scmp.lt.s32.totalorder %s18_s15, %s18_s15 }
   0xe   :  { %p247_p5 = scmp.ne.s32.totalorder %s18_s15, %s246_s19  ;;  %p252_p7 = scmp.lt.s32.totalorder %s246_s19, %s246_s19 }
  0x10   :  { %p253_p8 = por %p252_p7, %p251_p6 }
  0x12   :  { %p254_p9 = pnand %p253_p8, %p247_p5 }
  0x14   :  { %257 = shalt.err (!%p254_p9)
}
  0x15   :  { %20 = dma.hbm_to_vmem [thread:$0]  %s344_s0, 128, %s18_s15, [#allocation3]  }
  0x16   :  { %s306_s22 = smov [#allocation7]  }
  0x17   :  { %s36_s23 = sshll.u32 %s306_s22, 4  ;;  %s37_s23 = int_to_ptr.vmem [resolvable:$true] %s36_s23 }
  0x18   :  { %s266_s24 = scalar_lea.vmem %s37_s23, 2048  ;;  %p271_p11 = scmp.lt.s32.totalorder %s37_s23, %s37_s23 }
  0x19   :  { %p267_p10 = scmp.ne.s32.totalorder %s37_s23, %s266_s24  ;;  %p272_p12 = scmp.lt.s32.totalorder %s266_s24, %s266_s24 }
  0x1b   :  { %p273_p13 = por %p272_p12, %p271_p11 }
  0x1d   :  { %p274_p0 = pnand %p273_p13, %p267_p10 }
  0x1f   :  { %277 = shalt.err (!%p274_p0)
}
  0x20   :  { %s307_s1 = smov 128   ;;  %s308_s25 = smov 8  }
  0x21   :  { %42 = dma.hbm_to_vmem [thread:$0]  %s346_s2, 2048, %s37_s23, [#allocation6], %s307_s1, %s307_s1, %s308_s25  }
  0x22   :  { %298 = dma.done.wait [#allocation3], 128  }
  0x23   :  { %299 = vsyncadd [#allocation3], 4294967168 }
  0x24   :  { %300 = dma.done.wait [#allocation6], 2176  }
  0x25   :  { %301 = vsyncadd [#allocation6], 4294965120  ;;  %v309_v0 = vmov 0.0   ;;  %vm310_vm0 = vmmov 0   ;;  %v68_v1 = vld [vmem:[#allocation7 + $0x78] sm:$0xff]  ;;  %v67_v2 = vld [vmem:[#allocation7 + $0x70] sm:$0xff] }
  0x26   :  { %175 = vmatprep.subr.mxu0 %v309_v0  ;;  %207 = vmatprep.mubr.msk.f32.mxu0 %vm310_vm0, %v309_v0  ;;  %v66_v3 = vld [vmem:[#allocation7 + $0x68] sm:$0xff]  ;;  %v65_v4 = vld [vmem:[#allocation7 + $0x60] sm:$0xff]  ;;  %v64_v5 = vld [vmem:[#allocation7 + $0x58] sm:$0xff]  ;;  %s311_s0 = smov [#allocation8]  }
  0x27   :  { %176 = vmatpush3.msra.mxu0 %v68_v1  ;;  %v63_v6 = vld [vmem:[#allocation7 + $0x50] sm:$0xff]  ;;  %v62_v7 = vld [vmem:[#allocation7 + $0x48] sm:$0xff]  ;;  %v61_v8 = vld [vmem:[#allocation7 + $0x40] sm:$0xff]  ;;  %s148_s2 = sshll.u32 %s311_s0, 4  ;;  %s149_s2 = int_to_ptr.vmem [resolvable:$true] %s148_s2 }
  0x28   :  { %177 = vmatprep.subr.mxu0 %v309_v0  ;;  %v60_v9 = vld [vmem:[#allocation7 + $0x38] sm:$0xff]  ;;  %v59_v10 = vld [vmem:[#allocation7 + $0x30] sm:$0xff]  ;;  %v58_v11 = vld [vmem:[#allocation7 + $0x28] sm:$0xff]  ;;  %s278_s28 = scalar_lea.vmem %s149_s2, 128  ;;  %p283_p2 = scmp.lt.s32.totalorder %s149_s2, %s149_s2 }
  0x29   :  { %178 = vmatpush3.msra.mxu0 %v67_v2  ;;  %v57_v12 = vld [vmem:[#allocation7 + $0x20] sm:$0xff]  ;;  %v56_v13 = vld [vmem:[#allocation7 + $0x18] sm:$0xff]  ;;  %v55_v14 = vld [vmem:[#allocation7 + $0x10] sm:$0xff]  ;;  %p279_p1 = scmp.ne.s32.totalorder %s149_s2, %s278_s28  ;;  %p284_p3 = scmp.lt.s32.totalorder %s278_s28, %s278_s28 }
  0x2a   :  { %179 = vmatprep.subr.mxu0 %v309_v0  ;;  %v54_v15 = vld [vmem:[#allocation7 + $0x8] sm:$0xff]  ;;  %v53_v16 = vld [vmem:[#allocation7] sm:$0xff]  ;;  %v52_v17 = vld [vmem:[#allocation5] sm:$0xff] }
  0x2b   :  { %180 = vmatpush3.msra.mxu0 %v66_v3  ;;  %v139_v18 = vld [vmem:[#allocation2] sm:$0xff]  ;;  %p285_p4 = por %p284_p3, %p283_p2 }
  0x2c   :  { %181 = vmatprep.subr.mxu0 %v309_v0 }
  0x2d   :  { %182 = vmatpush3.msra.mxu0 %v65_v4  ;;  %p286_p5 = pnand %p285_p4, %p279_p1 }
  0x2e   :  { %183 = vmatprep.subr.mxu0 %v309_v0 }
  0x2f   :  { %184 = vmatpush3.msra.mxu0 %v64_v5 }
  0x30   :  { %185 = vmatprep.subr.mxu0 %v309_v0 }
  0x31   :  { %186 = vmatpush3.msra.mxu0 %v63_v6 }
  0x32   :  { %187 = vmatprep.subr.mxu0 %v309_v0 }
  0x33   :  { %188 = vmatpush3.msra.mxu0 %v62_v7 }
  0x34   :  { %189 = vmatprep.subr.mxu0 %v309_v0 }
  0x35   :  { %190 = vmatpush3.msra.mxu0 %v61_v8 }
  0x36   :  { %191 = vmatprep.subr.mxu0 %v309_v0 }
  0x37   :  { %192 = vmatpush3.msra.mxu0 %v60_v9 }
  0x38   :  { %193 = vmatprep.subr.mxu0 %v309_v0 }
  0x39   :  { %194 = vmatpush3.msra.mxu0 %v59_v10 }
  0x3a   :  { %195 = vmatprep.subr.mxu0 %v309_v0 }
  0x3b   :  { %196 = vmatpush3.msra.mxu0 %v58_v11 }
  0x3c   :  { %197 = vmatprep.subr.mxu0 %v309_v0 }
  0x3d   :  { %198 = vmatpush3.msra.mxu0 %v57_v12 }
  0x3e   :  { %199 = vmatprep.subr.mxu0 %v309_v0 }
  0x3f   :  { %200 = vmatpush3.msra.mxu0 %v56_v13 }
  0x40   :  { %201 = vmatprep.subr.mxu0 %v309_v0 }
  0x41   :  { %202 = vmatpush3.msra.mxu0 %v55_v14 }
  0x42   :  { %203 = vmatprep.subr.mxu0 %v309_v0 }
  0x43   :  { %204 = vmatpush3.msra.mxu0 %v54_v15 }
  0x44   :  { %205 = vmatprep.subr.mxu0 %v309_v0 }
  0x45   :  { %206 = vmatpush3.msra.mxu0 %v53_v16 }
  0x46   :  { %208 = vmatmul.mubr.f32.vlgmr.msra.gmra.mxu0 %v52_v17 }
 0x106   :  { %v135_v19 = vpop.f32.mrf.mxu0 }
 0x107   :  { %v140_v20 = vadd.f32 %v139_v18, %v135_v19 }
 0x108   :  { %v209_v21 = vpop.f32.mrf.mxu0 }
 0x109   :  { %141 = vst [vmem:[#allocation8] sm:$0xff] %v140_v20 }
 0x10a   :  { %289 = shalt.err (!%p286_p5)
}
 0x10b   :  { %151 = dma.vmem_to_hbm [thread:$0]  %s149_s2, 128, %s347_s3, [#allocation4]  }
 0x10c   :  { %302 = dma.done.wait [#allocation4], 128  }
 0x10d   :  { %303 = vsyncadd [#allocation4], 4294967168 }
 0x10e   :  { %155 = vsyncpa [#allocation3], 1 }
 0x10f   :  { %156 = vsyncpa [#allocation6], 1 }
 0x110   :  { %157 = vsyncpa [#allocation4], 1 }

</bundles_post_ra>
